<compile_context>
chip_gen: v6e
topology: v6e:2x2x1
jax: 0.10.0
libtpu: 0.0.40
codegen_flags: <defaults>
</compile_context>

<pallas_src>
import functools

import jax
import jax.numpy as jnp
from jax.experimental import pallas as pl
from jax.experimental.pallas import tpu as pltpu

LANES = 128
SUBLANES = 8
BLOCK_ROWS = 8192            # 8192 x 128 f32 = 4 MiB per input block
CHUNK_ROWS = 512             # in-kernel strip-mining granularity (512 x 128)
NUM_SPLITS = 2               # leading "parallel" axis -> per-TensorCore partials on v7x
VMEM_LIMIT_BYTES = 48 * 1024 * 1024  # 16 MiB of double-buffered inputs + headroom (<= v7x 64 MiB)


def _mse_partial_kernel(p_ref, t_ref, out_ref, *, nb, bps, rows, block_rows,
                        chunk_rows):
    """Accumulate per-lane partial sums of (p - t)^2 into a per-split (8,128) tile.

    Grid = (split, step). The output block index depends only on `split`, so the
    (8,128) output tile stays resident in VMEM across the inner reduction axis
    and doubles as the accumulator (no extra scratch).
    """
    c = pl.program_id(0)
    i = pl.program_id(1)
    blk = c * bps + i  # un-clamped global block index

    @pl.when(i == 0)
    def _():
        out_ref[...] = jnp.zeros_like(out_ref)

    n_chunks = block_rows // chunk_rows

    def accumulate(mask_tail):
        # Strip-mine the (block_rows, 128) block into bounded sub-chunks so the
        # load->sub->square->reduce chain stays within the 64-vreg file.
        def body(j, carry):
            start = pl.multiple_of(j * chunk_rows, chunk_rows)
            p = p_ref[pl.ds(start, chunk_rows), :].astype(jnp.float32)
            t = t_ref[pl.ds(start, chunk_rows), :].astype(jnp.float32)
            d = p - t
            if mask_tail:
                # Rows past `rows` in a partial last block hold unspecified
                # data; zero their contribution.
                row = (jax.lax.broadcasted_iota(jnp.int32, d.shape, 0)
                       + blk * block_rows + start)
                d = jnp.where(row < rows, d, 0.0)
            out_ref[...] += jnp.sum((d * d).reshape(-1, SUBLANES, LANES), axis=0)
            return carry

        jax.lax.fori_loop(0, n_chunks, body, 0)

    if rows % block_rows != 0:
        # Only the true last block is partial: keep every other block on the
        # minimal cast/sub/mul/add path (no iota/cmp/select).
        @pl.when(blk == nb - 1)
        def _():
            accumulate(True)

        @pl.when(blk < nb - 1)
        def _():
            accumulate(False)
    else:
        @pl.when(blk < nb)  # skip clamped duplicate blocks (odd block count)
        def _():
            accumulate(False)


def supervised_objective(prediction, truth):
    """Pallas TPU implementation of SupervisedLoss: MSE(prediction, truth) * 25000."""
    assert prediction.shape == truth.shape
    n_elems = prediction.size
    scale = 25000.0 / float(n_elems)

    p_flat = prediction.reshape(-1)
    t_flat = truth.reshape(-1)

    # Main region: largest prefix whose (rows, 128) reshape has rows % 8 == 0.
    n_main = (n_elems // (SUBLANES * LANES)) * (SUBLANES * LANES)

    # Tail (< 1024 elements): tiny plain-JAX correction instead of padding /
    # copying the whole arrays in HBM. Tail entries contribute exactly their
    # squared difference, so the sum splits cleanly.
    if n_main != n_elems:
        pt = p_flat[n_main:].astype(jnp.float32)
        tt = t_flat[n_main:].astype(jnp.float32)
        tail_sum = jnp.sum((pt - tt) ** 2)
    else:
        tail_sum = jnp.float32(0.0)

    if n_main == 0:
        # Input smaller than one (8,128) tile: not worth a kernel launch.
        return tail_sum * jnp.float32(scale)

    if n_main == n_elems:
        p_main, t_main = p_flat, t_flat            # free metadata reshape below
    else:
        p_main, t_main = p_flat[:n_main], t_flat[:n_main]
    p2 = p_main.reshape(-1, LANES)
    t2 = t_main.reshape(-1, LANES)
    rows = n_main // LANES                         # multiple of 8

    # Block selection: largest multiple-of-CHUNK_ROWS block up to BLOCK_ROWS.
    if rows >= CHUNK_ROWS:
        block_rows = min(BLOCK_ROWS, (rows // CHUNK_ROWS) * CHUNK_ROWS)
        chunk_rows = CHUNK_ROWS
    else:
        block_rows = rows                          # single (rows, 128) block
        chunk_rows = rows

    nb = pl.cdiv(rows, block_rows)                 # total number of blocks
    num_splits = NUM_SPLITS if nb >= NUM_SPLITS else 1
    bps = pl.cdiv(nb, num_splits)                  # blocks per split

    def in_index_map(c, i):
        # Clamp: the last split may own fewer real blocks (odd nb); the
        # duplicate block's compute is skipped in-kernel.
        return (jnp.minimum(c * bps + i, nb - 1), 0)

    kernel = functools.partial(
        _mse_partial_kernel, nb=nb, bps=bps, rows=rows,
        block_rows=block_rows, chunk_rows=chunk_rows)

    partials = pl.pallas_call(
        kernel,
        out_shape=jax.ShapeDtypeStruct((num_splits, SUBLANES, LANES), jnp.float32),
        grid_spec=pltpu.PrefetchScalarGridSpec(
            num_scalar_prefetch=0,
            grid=(num_splits, bps),
            in_specs=[
                pl.BlockSpec((block_rows, LANES), in_index_map),
                pl.BlockSpec((block_rows, LANES), in_index_map),
            ],
            out_specs=pl.BlockSpec((None, SUBLANES, LANES),
                                   lambda c, i: (c, 0, 0)),
        ),
        compiler_params=pltpu.CompilerParams(
            dimension_semantics=("parallel", "arbitrary"),
            vmem_limit_bytes=VMEM_LIMIT_BYTES,
        ),
    )(p2, t2)

    # Single tiny cross-lane reduce of the per-split partial tiles + scale.
    return (jnp.sum(partials) + tail_sum) * jnp.float32(scale)


class Objective:
    """JAX/Pallas port of the PyTorch Objective module (default: supervised)."""

    def __init__(self, *args, supervised=True, function=None, **kwargs):
        if function is not None:
            if callable(function):
                self.function = function
            else:
                raise TypeError(
                    "Cannot use {} as an objective function. Must be a callable.".format(
                        type(function)
                    )
                )
        elif supervised:
            self.function = supervised_objective
        else:
            # TODO(synk): SelfSupervisedLoss (gridsample_residual + masklib.dilate)
            # not implemented in Pallas.
            raise NotImplementedError("Only the supervised objective is implemented.")

    def __call__(self, *args, **kwargs):
        return self.function(*args, **kwargs)


if __name__ == "__main__":
    key = jax.random.PRNGKey(0)
    k1, k2, k3, k4, k5, k6 = jax.random.split(key, 6)

    obj = Objective(supervised=True)

    # 1) Residual-field shape, lane/tile aligned -> zero-copy fast path.
    pred = jax.random.normal(k1, (2, 16, 16, 2), dtype=jnp.float32) * 0.05
    truth = jax.random.normal(k2, (2, 16, 16, 2), dtype=jnp.float32) * 0.05
    loss = jax.block_until_ready(obj(pred, truth))
    ref = jnp.mean((pred - truth) ** 2) * 25000.0
    assert jnp.allclose(loss, ref, rtol=1e-4, atol=1e-4), (loss, ref)

    # 2) Misaligned shape -> kernel on the aligned prefix + plain-JAX tail.
    pred2 = jax.random.normal(k3, (2, 19, 37, 2), dtype=jnp.float32) * 0.05
    truth2 = jax.random.normal(k4, (2, 19, 37, 2), dtype=jnp.float32) * 0.05
    loss2 = jax.block_until_ready(obj(pred2, truth2))
    ref2 = jnp.mean((pred2 - truth2) ** 2) * 25000.0
    assert jnp.allclose(loss2, ref2, rtol=1e-4, atol=1e-4), (loss2, ref2)

    # 3) Larger field: exercises the 2-split parallel axis, multi-chunk
    #    strip-mining and the masked partial last block.
    pred3 = jax.random.normal(k5, (3, 160, 160, 2), dtype=jnp.float32) * 0.05
    truth3 = jax.random.normal(k6, (3, 160, 160, 2), dtype=jnp.float32) * 0.05
    loss3 = jax.block_until_ready(obj(pred3, truth3))
    ref3 = jnp.mean((pred3 - truth3) ** 2) * 25000.0
    assert jnp.allclose(loss3, ref3, rtol=1e-4, atol=1e-4), (loss3, ref3)

    print("KERNEL_OK")
</pallas_src>

<mosaic_0001>
module attributes {stable_mosaic.version = 11 : i64} {
  func.func @_mse_partial_kernel(%arg0: i32, %arg1: i32, %arg2: memref<8x128xf32, #tpu.memory_space<vmem>>, %arg3: memref<8x128xf32, #tpu.memory_space<vmem>>, %arg4: memref<1x8x128xf32, #tpu.memory_space<vmem>>) attributes {dimension_semantics = [#tpu.dimension_semantics<parallel>, #tpu.dimension_semantics<arbitrary>], iteration_bounds = array<i64: 1, 1>, scalar_prefetch = 0 : i64, scratch_operands = 0 : i64, tpu.core_type = #tpu.core_type<tc>, window_params = [{transform_indices = @transform_0, window_bounds = array<i64: 8, 128>}, {transform_indices = @transform_1, window_bounds = array<i64: 8, 128>}, {transform_indices = @transform_2, window_bounds = array<i64: 1, 8, 128>}]} {
    %c1_i32 = arith.constant 1 : i32
    %0 = arith.muli %arg0, %c1_i32 : i32
    %1 = arith.addi %0, %arg1 : i32
    %c0_i32 = arith.constant 0 : i32
    %2 = arith.cmpi eq, %arg1, %c0_i32 : i32
    %3 = arith.extui %2 : i1 to i32
    %c0_i32_0 = arith.constant 0 : i32
    %4 = arith.cmpi ne, %3, %c0_i32_0 : i32
    scf.if %4 {
      %cst = arith.constant 0.000000e+00 : f32
      %8 = vector.broadcast %cst : f32 to vector<8x128xf32>
      %c0 = arith.constant 0 : index
      %c0_3 = arith.constant 0 : index
      %c0_4 = arith.constant 0 : index
      %9 = vector.load %arg4[%c0, %c0_3, %c0_4] : memref<1x8x128xf32, #tpu.memory_space<vmem>>, vector<1x8x128xf32>
      %10 = vector.shape_cast %9 : vector<1x8x128xf32> to vector<8x128xf32>
      %11 = vector.shape_cast %8 : vector<8x128xf32> to vector<1x8x128xf32>
      tpu.vector_store %arg4[%c0, %c0_3, %c0_4], %11 {strides = array<i32>} : memref<1x8x128xf32, #tpu.memory_space<vmem>>, vector<1x8x128xf32>,
    } else {
    }
    %c1_i32_1 = arith.constant 1 : i32
    %5 = arith.cmpi slt, %1, %c1_i32_1 : i32
    %6 = arith.extui %5 : i1 to i32
    %c0_i32_2 = arith.constant 0 : i32
    %7 = arith.cmpi ne, %6, %c0_i32_2 : i32
    scf.if %7 {
      %c0_i32_3 = arith.constant 0 : i32
      %c8_i32 = arith.constant 8 : i32
      %8 = arith.muli %c0_i32_3, %c8_i32 : i32
      %9 = tpu.assume_multiple %8, 8 : i32
      %10 = arith.index_cast %9 : i32 to index
      %c0 = arith.constant 0 : index
      %11 = vector.load %arg2[%10, %c0] : memref<8x128xf32, #tpu.memory_space<vmem>>, vector<8x128xf32>
      %12 = arith.index_cast %9 : i32 to index
      %c0_4 = arith.constant 0 : index
      %13 = vector.load %arg3[%12, %c0_4] : memref<8x128xf32, #tpu.memory_space<vmem>>, vector<8x128xf32>
      %14 = arith.subf %11, %13 : vector<8x128xf32>
      %c0_5 = arith.constant 0 : index
      %c0_6 = arith.constant 0 : index
      %c0_7 = arith.constant 0 : index
      %15 = vector.load %arg4[%c0_5, %c0_6, %c0_7] : memref<1x8x128xf32, #tpu.memory_space<vmem>>, vector<1x8x128xf32>
      %16 = vector.shape_cast %15 : vector<1x8x128xf32> to vector<8x128xf32>
      %17 = arith.mulf %14, %14 : vector<8x128xf32>
      %18 = vector.shape_cast %17 : vector<8x128xf32> to vector<1x8x128xf32>
      %cst = arith.constant dense<0.000000e+00> : vector<8x128xf32>
      %19 = vector.multi_reduction <add>, %18, %cst [0] : vector<1x8x128xf32> to vector<8x128xf32>
      %20 = arith.addf %16, %19 : vector<8x128xf32>
      %c0_8 = arith.constant 0 : index
      %c0_9 = arith.constant 0 : index
      %c0_10 = arith.constant 0 : index
      %21 = vector.load %arg4[%c0_8, %c0_9, %c0_10] : memref<1x8x128xf32, #tpu.memory_space<vmem>>, vector<1x8x128xf32>
      %22 = vector.shape_cast %21 : vector<1x8x128xf32> to vector<8x128xf32>
      %23 = vector.shape_cast %20 : vector<8x128xf32> to vector<1x8x128xf32>
      tpu.vector_store %arg4[%c0_8, %c0_9, %c0_10], %23 {strides = array<i32>} : memref<1x8x128xf32, #tpu.memory_space<vmem>>, vector<1x8x128xf32>,
      %c1_i32_11 = arith.constant 1 : i32
    } else {
    }
    return
  }
  func.func @transform_0(%arg0: i32, %arg1: i32) -> (i32, i32) {
    %c1_i32 = arith.constant 1 : i32
    %0 = arith.muli %arg0, %c1_i32 : i32
    %1 = arith.addi %0, %arg1 : i32
    %c0_i32 = arith.constant 0 : i32
    %2 = arith.minsi %1, %c0_i32 : i32
    %c0_i32_0 = arith.constant 0 : i32
    %c0_i32_1 = arith.constant 0 : i32
    return %2, %c0_i32_0 : i32, i32
  }
  func.func @transform_1(%arg0: i32, %arg1: i32) -> (i32, i32) {
    %c1_i32 = arith.constant 1 : i32
    %0 = arith.muli %arg0, %c1_i32 : i32
    %1 = arith.addi %0, %arg1 : i32
    %c0_i32 = arith.constant 0 : i32
    %2 = arith.minsi %1, %c0_i32 : i32
    %c0_i32_0 = arith.constant 0 : i32
    %c0_i32_1 = arith.constant 0 : i32
    return %2, %c0_i32_0 : i32, i32
  }
  func.func @transform_2(%arg0: i32, %arg1: i32) -> (i32, i32, i32) {
    %c0_i32 = arith.constant 0 : i32
    %c0_i32_0 = arith.constant 0 : i32
    %c0_i32_1 = arith.constant 0 : i32
    return %arg0, %c0_i32, %c0_i32_0 : i32, i32, i32
  }
}

</mosaic_0001>

<bundles_post_ra>
// kernel: tpu_custom_call.1
= control target key start
LH: loop header
LB: loop body
LE: loop exit
PB: predicated region body
PF: predicated region fallthrough
CT: control target
= control target key end

     0   :  { %7 = vsyncpa [#allocation3], 0  ;;  %s187_s0 = inlined_call_operand.hbm [shape: f32[8,128], index: 0, kind: input, shape index: {}]   ;;  %s188_s1 = inlined_call_operand.hbm [shape: f32[8,128], index: 1, kind: input, shape index: {}]   ;;  %s189_s2 = inlined_call_operand.hbm [shape: f32[1,8,128], index: 2, kind: output, shape index: {}]  }
   0x1   :  { %8 = vsyncpa [#allocation6], 0 }
   0x2   :  { %9 = vsyncpa [#allocation4], 0  ;;  %s160_s9 = smov [#allocation2]   ;;  %s161_s11 = smov [#allocation5]  }
   0x3   :  { %s21_s10 = sshll.u32 %s160_s9, 4  ;;  %s36_s12 = sshll.u32 %s161_s11, 4  ;;  %s22_s10 = int_to_ptr.vmem [resolvable:$true] %s21_s10  ;;  %s37_s12 = int_to_ptr.vmem [resolvable:$true] %s36_s12 }
   0x4   :  { %s102_s13 = scalar_lea.vmem %s22_s10, 128  ;;  %p107_p1 = scmp.lt.s32.totalorder %s22_s10, %s22_s10 }
   0x5   :  { %p103_p0 = scmp.ne.s32.totalorder %s22_s10, %s102_s13  ;;  %p108_p2 = scmp.lt.s32.totalorder %s102_s13, %s102_s13 }
   0x7   :  { %p109_p3 = por %p108_p2, %p107_p1 }
   0x9   :  { %p110_p4 = pnand %p109_p3, %p103_p0 }
   0xb   :  { %113 = shalt.err (!%p110_p4)
}
   0xc   :  { %24 = dma.hbm_to_vmem [thread:$0]  %s187_s0, 128, %s22_s10, [#allocation3]  }
   0xd   :  { %s122_s16 = scalar_lea.vmem %s37_s12, 128  ;;  %p127_p6 = scmp.lt.s32.totalorder %s37_s12, %s37_s12 }
   0xe   :  { %p123_p5 = scmp.ne.s32.totalorder %s37_s12, %s122_s16  ;;  %p128_p7 = scmp.lt.s32.totalorder %s122_s16, %s122_s16 }
  0x10   :  { %p129_p8 = por %p128_p7, %p127_p6 }
  0x12   :  { %p130_p9 = pnand %p129_p8, %p123_p5 }
  0x14   :  { %133 = shalt.err (!%p130_p9)
}
  0x15   :  { %39 = dma.hbm_to_vmem [thread:$0]  %s188_s1, 128, %s37_s12, [#allocation6]  }
  0x16   :  { %154 = dma.done.wait [#allocation3], 128  }
  0x17   :  { %155 = vsyncadd [#allocation3], 4294967168 }
  0x18   :  { %156 = dma.done.wait [#allocation6], 128  }
  0x19   :  { %157 = vsyncadd [#allocation6], 4294967168  ;;  %v62_v0 = vld [vmem:[#allocation2] sm:$0xff]  ;;  %v63_v1 = vld [vmem:[#allocation5] sm:$0xff]  ;;  %s162_s19 = smov [#allocation7]  }
  0x1a   :  { %v64_v2 = vsub.f32 %v62_v0, %v63_v1  ;;  %s76_s0 = sshll.u32 %s162_s19, 4  ;;  %s77_s0 = int_to_ptr.vmem [resolvable:$true] %s76_s0 }
  0x1b   :  { %s134_s20 = scalar_lea.vmem %s77_s0, 128  ;;  %p139_p11 = scmp.lt.s32.totalorder %s77_s0, %s77_s0 }
  0x1c   :  { %v66_v3 = vmul.f32 %v64_v2, %v64_v2  ;;  %p135_p10 = scmp.ne.s32.totalorder %s77_s0, %s134_s20  ;;  %p140_p12 = scmp.lt.s32.totalorder %s134_s20, %s134_s20 }
  0x1e   :  { %69 = vst [vmem:[#allocation7] sm:$0xff] %v66_v3  ;;  %p141_p13 = por %p140_p12, %p139_p11 }
  0x20   :  { %p142_p0 = pnand %p141_p13, %p135_p10 }
  0x22   :  { %145 = shalt.err (!%p142_p0)
}
  0x23   :  { %79 = dma.vmem_to_hbm [thread:$0]  %s77_s0, 128, %s189_s2, [#allocation4]  }
  0x24   :  { %158 = dma.done.wait [#allocation4], 128  }
  0x25   :  { %159 = vsyncadd [#allocation4], 4294967168 }
  0x26   :  { %83 = vsyncpa [#allocation3], 1 }
  0x27   :  { %84 = vsyncpa [#allocation6], 1 }
  0x28   :  { %85 = vsyncpa [#allocation4], 1 }

</bundles_post_ra>
